<compile_context>
chip_gen: v6e
topology: v6e:2x2x1
jax: 0.10.0
libtpu: 0.0.40
codegen_flags: <defaults>
</compile_context>

<pallas_src>
import functools

import jax
import jax.numpy as jnp
from jax.experimental import pallas as pl
from jax.experimental.pallas import tpu as pltpu


# Padded observations use x = 1e18: (1e18 - t)^2 = 1e36 stays finite in f32 and
# exp(-0.5 * 1e36 / scale^2) underflows to exactly 0 for any realistic length
# scale (requires exp(sigma) << 1e17), so padded rows contribute nothing to the
# density / conv sums.  This only holds while the kernel math stays in f32.
_PAD_SENTINEL = 1e18


def convdeepset_kernel(scale_ref, params_ref, t_ref, x_ref, y_ref, o_ref,
                       dens_acc, conv_acc, *, ck, num_chunks):
    """One (batch-tile, target-tile, obs-tile) grid step.

    scale_ref  : SMEM (1, 2)        -0.5 / exp(sigma_c)**2 per input channel
    params_ref : VMEM (C, 3)        columns = [W[:, 0], W[:, 1], bias]
    t_ref      : VMEM (TB, 1, TO)   target inputs (lane-major)
    x_ref      : VMEM (TB, TK, 1)   observation inputs (sublane-major)
    y_ref      : VMEM (TB, 1, TK)   observation values (lane-major, MXU lhs)
    o_ref      : VMEM (TB, C, TO)   output, channel-major (lane-dense store)
    dens_acc   : VMEM (TB, 1, TO)   running density sum over N_in
    conv_acc   : VMEM (TB, 1, TO)   running weighted-value sum over N_in
    """
    k = pl.program_id(2)

    @pl.when(k == 0)
    def _init():
        dens_acc[...] = jnp.zeros_like(dens_acc)
        conv_acc[...] = jnp.zeros_like(conv_acc)

    t = t_ref[...]                           # (TB, 1, TO)
    c0 = scale_ref[0, 0]                     # density-channel exponent scale
    c1 = scale_ref[0, 1]                     # data-channel exponent scale
    tb = t.shape[0]
    ones_lhs = jnp.ones((tb, 1, ck), jnp.float32)

    def accumulate(x, yv):
        # x: (TB, ck, 1), yv: (TB, 1, ck)
        d = (x - t) ** 2                     # (TB, ck, TO) pairwise sq. distances
        wt0 = jnp.exp(d * c0)                # psi(x, t), density channel
        wt1 = jnp.exp(d * c1)                # psi(x, t), data channel
        # N_in reductions as MXU matvecs (extended slot; VPU/XLU stay free).
        # HIGHEST keeps f32 accuracy so results match the plain-sum reference.
        # TODO(synk): optional bf16 exp + bf16 MXU path (v6e/v7x) is left out
        # because its ~0.4% error breaks the rtol=1e-4 check vs the f32 ref.
        dens_acc[...] += jnp.einsum(
            'bok,bkt->bot', ones_lhs, wt0,
            precision=jax.lax.Precision.HIGHEST,
            preferred_element_type=jnp.float32)
        conv_acc[...] += jnp.einsum(
            'bok,bkt->bot', yv, wt1,
            precision=jax.lax.Precision.HIGHEST,
            preferred_element_type=jnp.float32)

    if num_chunks == 1:
        accumulate(x_ref[...], y_ref[...])
    else:
        def chunk_body(i, carry):
            start = pl.multiple_of(i * ck, ck)
            accumulate(x_ref[:, pl.ds(start, ck), :],    # sublane slice, ck % 8 == 0
                       y_ref[:, :, pl.ds(start, ck)])    # lane slice, ck % 128 == 0
            return carry
        jax.lax.fori_loop(0, num_chunks, chunk_body, 0,
                          unroll=(num_chunks <= 4))

    @pl.when(k == pl.num_programs(2) - 1)
    def _finalize():
        density = dens_acc[...]                                   # (TB, 1, TO)
        inv_density = pl.reciprocal(density + 1e-8, approx=False)
        normalized = conv_acc[...] * inv_density                  # (TB, 1, TO)
        p = params_ref[...]                                       # (C, 3)
        w0 = p[:, 0:1][None]                                      # (1, C, 1)
        w1 = p[:, 1:2][None]                                      # (1, C, 1)
        b = p[:, 2:3][None]                                       # (1, C, 1)
        # point-wise Linear(2 -> C); channel-major so the store is lane-dense.
        o_ref[...] = (density * w0 + normalized * w1 + b).astype(o_ref.dtype)


def _round_up(a, m):
    return (a + m - 1) // m * m


def _choose_tiles(B, n_in, n_out, C):
    """Generation-aware tile selection.  Returns (TB, TK, CK, TO, vmem_limit)."""
    try:  # 128 MiB on v5e/v6e, 64 MiB on v7x
        vmem_cap = int(pltpu.get_tpu_info().vmem_capacity_bytes)
    except Exception:
        vmem_cap = 64 << 20                      # conservative (v7x-sized) default
    live_budget = min(vmem_cap // 2, 48 << 20)   # per-step live-set budget
    vmem_limit = int(min(vmem_cap * 3 // 4, 96 << 20))

    # Lane tile over targets (multiple of 128 whenever the axis is tiled).
    TO = n_out if n_out <= 1024 else 1024

    # Per-step observation tile TK and the in-kernel sub-chunk CK (sublane axis).
    if n_in <= 256:
        TK = _round_up(max(n_in, 1), 8)
        CK = TK                                  # single chunk, static offsets
    else:
        TK = min(_round_up(n_in, 256), 2048)
        CK = 256

    # Per-batch-element live VMEM (f32): chunk temporaries (d / wt0 / wt1 + one
    # spare), double-buffered x (lane-padded to 128), y, t, out blocks and the
    # two accumulators.
    per_batch = 4 * CK * TO * 4
    per_batch += 2 * TK * 128 * 4
    per_batch += 2 * 8 * TK * 4
    per_batch += 2 * 8 * TO * 4
    per_batch += 2 * _round_up(C, 8) * TO * 4
    per_batch += 2 * 8 * TO * 4
    TB = max(1, min(B, live_budget // max(per_batch, 1)))

    # Keep >= 2 parallel grid steps so both TensorCores of dual-core chips
    # (v7x) get work; costs at most one extra tiny step on single-core chips.
    if B >= 2:
        if (B + TB - 1) // TB < 2:
            TB = (B + 1) // 2
    elif n_out >= 256 and _round_up(n_out, TO) // TO < 2:
        TO = _round_up((n_out + 1) // 2, 128)

    return TB, TK, CK, TO, vmem_limit


def conv_deep_set(x, y, t, sigma, weight, bias):
    """Pallas ConvDeepSet forward.

    x: (B, N_in, 1), y: (B, N_in, 1), t: (B, N_out, 1)
    sigma: (2,) log length scales; weight: (C, 2) torch-Linear layout; bias: (C,)
    returns: (B, N_out, C)
    """
    B, n_in, _ = x.shape
    n_out = t.shape[1]
    C = weight.shape[0]

    TB, TK, CK, TO, vmem_limit = _choose_tiles(B, n_in, n_out, C)
    Bp, Kp, Op = _round_up(B, TB), _round_up(n_in, TK), _round_up(n_out, TO)

    xf = x.astype(jnp.float32).reshape(B, n_in, 1)    # sublane-major obs inputs
    yf = y.astype(jnp.float32).reshape(B, 1, n_in)    # lane-major obs values
    tf = t.astype(jnp.float32).reshape(B, 1, n_out)   # lane-major targets

    # Pad to tile multiples.  Padded observations use the sentinel so their RBF
    # weight underflows to exactly 0; padded targets / batches are sliced away.
    if Kp > n_in:
        xf = jnp.pad(xf, ((0, 0), (0, Kp - n_in), (0, 0)),
                     constant_values=_PAD_SENTINEL)
        yf = jnp.pad(yf, ((0, 0), (0, 0), (0, Kp - n_in)))
    if Op > n_out:
        tf = jnp.pad(tf, ((0, 0), (0, 0), (0, Op - n_out)))
    if Bp > B:
        xf = jnp.pad(xf, ((0, Bp - B), (0, 0), (0, 0)),
                     constant_values=_PAD_SENTINEL)
        yf = jnp.pad(yf, ((0, Bp - B), (0, 0), (0, 0)))
        tf = jnp.pad(tf, ((0, Bp - B), (0, 0), (0, 0)))

    # Parameter glue: length scales -> -0.5 / exp(sigma)^2 (SMEM scalars);
    # Linear weight/bias packed into one tiny (C, 3) VMEM block.
    neg_half_inv = (-0.5 / jnp.exp(sigma.astype(jnp.float32)) ** 2).reshape(1, 2)
    params = jnp.concatenate(
        [weight.astype(jnp.float32), bias.astype(jnp.float32).reshape(C, 1)],
        axis=1)                                                   # (C, 3)

    grid = (Bp // TB, Op // TO, Kp // TK)
    num_chunks = TK // CK
    kernel = functools.partial(convdeepset_kernel, ck=CK, num_chunks=num_chunks)

    pairs = B * n_in * n_out
    cost = pl.CostEstimate(
        flops=int(10 * pairs),                  # sub/sq/scale + 2-channel MXU MACs
        transcendentals=int(2 * pairs),         # two exps per (x, t) pair
        bytes_accessed=int(4 * (xf.size + yf.size + tf.size + Bp * C * Op)),
    )

    out_cm = pl.pallas_call(
        kernel,
        out_shape=jax.ShapeDtypeStruct((Bp, C, Op), jnp.float32),
        grid=grid,
        in_specs=[
            pl.BlockSpec(memory_space=pltpu.MemorySpace.SMEM),        # RBF scales
            pl.BlockSpec((C, 3), lambda b, j, k: (0, 0)),             # W | bias
            pl.BlockSpec((TB, 1, TO), lambda b, j, k: (b, 0, j)),     # t
            pl.BlockSpec((TB, TK, 1), lambda b, j, k: (b, k, 0)),     # x
            pl.BlockSpec((TB, 1, TK), lambda b, j, k: (b, 0, k)),     # y
        ],
        out_specs=pl.BlockSpec((TB, C, TO), lambda b, j, k: (b, 0, j)),
        scratch_shapes=[
            pltpu.VMEM((TB, 1, TO), jnp.float32),   # density accumulator
            pltpu.VMEM((TB, 1, TO), jnp.float32),   # conv accumulator
        ],
        compiler_params=pltpu.CompilerParams(
            dimension_semantics=("parallel", "parallel", "arbitrary"),
            vmem_limit_bytes=vmem_limit),
        cost_estimate=cost,
    )(neg_half_inv, params, tf, xf, yf)

    # Slice off padding and return in the module's (B, N_out, C) layout.
    return jnp.transpose(out_cm[:B, :, :n_out], (0, 2, 1))


def ref_forward(x, y, t, sigma, weight, bias):
    """Pure-JAX replica of the PyTorch forward pass (for verification)."""
    scales = jnp.exp(sigma)                                     # (2,)
    dists = (x - jnp.transpose(t, (0, 2, 1))) ** 2              # (B, N_in, N_out)
    wt = jnp.exp(-0.5 * dists[..., None] / scales[None, None, None, :] ** 2)
    B, n_in, _ = x.shape
    density = jnp.ones((B, n_in, 1), jnp.float32)
    y_out = jnp.concatenate([density, y], axis=2)               # (B, N_in, 2)
    y_out = y_out[:, :, None, :] * wt                           # (B, N_in, N_out, 2)
    y_out = y_out.sum(1)                                        # (B, N_out, 2)
    den, conv = y_out[..., :1], y_out[..., 1:]
    normalized = conv / (den + 1e-8)
    # point-wise Linear(2 -> C), written elementwise so the f32 reference is not
    # perturbed by TPU default-precision matmul truncation.
    return (den * weight[None, None, :, 0]
            + normalized * weight[None, None, :, 1]
            + bias[None, None, :])                              # (B, N_out, C)


if __name__ == "__main__":
    B, n_in, n_out, C = 2, 8, 16, 4
    init_length_scale = 0.5

    key = jax.random.PRNGKey(0)
    k1, k2, k3, k4, k5 = jax.random.split(key, 5)
    x = jax.random.uniform(k1, (B, n_in, 1), jnp.float32, minval=-2.0, maxval=2.0)
    y = jax.random.normal(k2, (B, n_in, 1), jnp.float32)
    t = jax.random.uniform(k3, (B, n_out, 1), jnp.float32, minval=-2.0, maxval=2.0)

    # deterministic parameter init (matches module __init__ shapes)
    sigma = jnp.log(init_length_scale) * jnp.ones((2,), jnp.float32)   # in_channels
    weight = jax.random.normal(k4, (C, 2), jnp.float32) / jnp.sqrt(2.0)  # Linear(2,C)
    bias = 0.1 * jax.random.normal(k5, (C,), jnp.float32)

    out = jax.jit(conv_deep_set)(x, y, t, sigma, weight, bias)
    out = jax.block_until_ready(out)

    ref = ref_forward(x, y, t, sigma, weight, bias)
    assert out.shape == (B, n_out, C)
    err = float(jnp.max(jnp.abs(out - ref)))
    assert jnp.allclose(out, ref, rtol=1e-4, atol=1e-5), err
    print("KERNEL_OK")
</pallas_src>

<mosaic_0001>
module attributes {stable_mosaic.version = 11 : i64} {
  func.func @convdeepset_kernel(%arg0: i32, %arg1: i32, %arg2: i32, %arg3: memref<1x2xf32, #tpu.memory_space<smem>>, %arg4: memref<4x3xf32, #tpu.memory_space<vmem>>, %arg5: memref<1x1x16xf32, #tpu.memory_space<vmem>>, %arg6: memref<1x8x1xf32, #tpu.memory_space<vmem>>, %arg7: memref<1x1x8xf32, #tpu.memory_space<vmem>>, %arg8: memref<1x4x16xf32, #tpu.memory_space<vmem>>, %arg9: memref<1x1x16xf32, #tpu.memory_space<vmem>>, %arg10: memref<1x1x16xf32, #tpu.memory_space<vmem>>) attributes {dimension_semantics = [#tpu.dimension_semantics<parallel>, #tpu.dimension_semantics<parallel>, #tpu.dimension_semantics<arbitrary>], iteration_bounds = array<i64: 2, 1, 1>, scalar_prefetch = 0 : i64, scratch_operands = 2 : i64, tpu.core_type = #tpu.core_type<tc>, window_params = [{transform_indices = @transform_0, window_bounds = array<i64: 1, 2>}, {pipeline_mode = #tpu.pipeline_mode<synchronous>, transform_indices = @transform_1, window_bounds = array<i64: 4, 3>}, {transform_indices = @transform_2, window_bounds = array<i64: 1, 1, 16>}, {transform_indices = @transform_3, window_bounds = array<i64: 1, 8, 1>}, {transform_indices = @transform_4, window_bounds = array<i64: 1, 1, 8>}, {transform_indices = @transform_5, window_bounds = array<i64: 1, 4, 16>}]} {
    %c0_i32 = arith.constant 0 : i32
    %0 = arith.cmpi eq, %arg2, %c0_i32 : i32
    %1 = arith.extui %0 : i1 to i32
    %c0_i32_0 = arith.constant 0 : i32
    %2 = arith.cmpi ne, %1, %c0_i32_0 : i32
    scf.if %2 {
      %cst_28 = arith.constant 0.000000e+00 : f32
      %30 = vector.broadcast %cst_28 : f32 to vector<1x1x16xf32>
      %c0_29 = arith.constant 0 : index
      %c0_30 = arith.constant 0 : index
      %c0_31 = arith.constant 0 : index
      %31 = vector.load %arg9[%c0_29, %c0_30, %c0_31] : memref<1x1x16xf32, #tpu.memory_space<vmem>>, vector<1x1x16xf32>
      tpu.vector_store %arg9[%c0_29, %c0_30, %c0_31], %30 {strides = array<i32>} : memref<1x1x16xf32, #tpu.memory_space<vmem>>, vector<1x1x16xf32>,
      %cst_32 = arith.constant 0.000000e+00 : f32
      %32 = vector.broadcast %cst_32 : f32 to vector<1x1x16xf32>
      %c0_33 = arith.constant 0 : index
      %c0_34 = arith.constant 0 : index
      %c0_35 = arith.constant 0 : index
      %33 = vector.load %arg10[%c0_33, %c0_34, %c0_35] : memref<1x1x16xf32, #tpu.memory_space<vmem>>, vector<1x1x16xf32>
      tpu.vector_store %arg10[%c0_33, %c0_34, %c0_35], %32 {strides = array<i32>} : memref<1x1x16xf32, #tpu.memory_space<vmem>>, vector<1x1x16xf32>,
    } else {
    }
    %c0 = arith.constant 0 : index
    %c0_1 = arith.constant 0 : index
    %c0_2 = arith.constant 0 : index
    %3 = vector.load %arg5[%c0, %c0_1, %c0_2] : memref<1x1x16xf32, #tpu.memory_space<vmem>>, vector<1x1x16xf32>
    %c0_3 = arith.constant 0 : index
    %c0_4 = arith.constant 0 : index
    %4 = memref.load %arg3[%c0_3, %c0_4] : memref<1x2xf32, #tpu.memory_space<smem>>
    %c0_5 = arith.constant 0 : index
    %c1 = arith.constant 1 : index
    %5 = memref.load %arg3[%c0_5, %c1] : memref<1x2xf32, #tpu.memory_space<smem>>
    %cst = arith.constant 1.000000e+00 : f32
    %6 = vector.broadcast %cst : f32 to vector<1x1x8xf32>
    %c0_6 = arith.constant 0 : index
    %c0_7 = arith.constant 0 : index
    %c0_8 = arith.constant 0 : index
    %7 = vector.load %arg6[%c0_6, %c0_7, %c0_8] : memref<1x8x1xf32, #tpu.memory_space<vmem>>, vector<1x8x1xf32>
    %c0_9 = arith.constant 0 : index
    %c0_10 = arith.constant 0 : index
    %c0_11 = arith.constant 0 : index
    %8 = vector.load %arg7[%c0_9, %c0_10, %c0_11] : memref<1x1x8xf32, #tpu.memory_space<vmem>>, vector<1x1x8xf32>
    %9 = vector.broadcast %7 : vector<1x8x1xf32> to vector<1x8x16xf32>
    %10 = vector.broadcast %3 : vector<1x1x16xf32> to vector<1x8x16xf32>
    %11 = arith.subf %9, %10 : vector<1x8x16xf32>
    %12 = arith.mulf %11, %11 : vector<1x8x16xf32>
    %13 = vector.broadcast %4 : f32 to vector<1x8x16xf32>
    %14 = arith.mulf %12, %13 : vector<1x8x16xf32>
    %15 = math.exp %14 : vector<1x8x16xf32>
    %16 = vector.broadcast %5 : f32 to vector<1x8x16xf32>
    %17 = arith.mulf %12, %16 : vector<1x8x16xf32>
    %18 = math.exp %17 : vector<1x8x16xf32>
    %c0_12 = arith.constant 0 : index
    %c0_13 = arith.constant 0 : index
    %c0_14 = arith.constant 0 : index
    %19 = vector.load %arg9[%c0_12, %c0_13, %c0_14] : memref<1x1x16xf32, #tpu.memory_space<vmem>>, vector<1x1x16xf32>
    "tpu.trace_start"() <{level = 10 : i32, message = "bok,bkt->bot"}> : () -> ()
    %cst_15 = arith.constant dense<0.000000e+00> : vector<1x1x16xf32>
    %20 = tpu.matmul %6, %15, %cst_15 {dimension_numbers = #tpu.dot_dimension_numbers<[2], [1], [1], [2], [0, 0, 0, 1, 1, 2], [0], [0]>, precision = #tpu.contract_precision<fp32>} : vector<1x1x8xf32>, vector<1x8x16xf32>, vector<1x1x16xf32> -> vector<1x1x16xf32>
    "tpu.trace_stop"() : () -> ()
    %21 = arith.addf %19, %20 : vector<1x1x16xf32>
    %c0_16 = arith.constant 0 : index
    %c0_17 = arith.constant 0 : index
    %c0_18 = arith.constant 0 : index
    %22 = vector.load %arg9[%c0_16, %c0_17, %c0_18] : memref<1x1x16xf32, #tpu.memory_space<vmem>>, vector<1x1x16xf32>
    tpu.vector_store %arg9[%c0_16, %c0_17, %c0_18], %21 {strides = array<i32>} : memref<1x1x16xf32, #tpu.memory_space<vmem>>, vector<1x1x16xf32>,
    %c0_19 = arith.constant 0 : index
    %c0_20 = arith.constant 0 : index
    %c0_21 = arith.constant 0 : index
    %23 = vector.load %arg10[%c0_19, %c0_20, %c0_21] : memref<1x1x16xf32, #tpu.memory_space<vmem>>, vector<1x1x16xf32>
    "tpu.trace_start"() <{level = 10 : i32, message = "bok,bkt->bot"}> : () -> ()
    %cst_22 = arith.constant dense<0.000000e+00> : vector<1x1x16xf32>
    %24 = tpu.matmul %8, %18, %cst_22 {dimension_numbers = #tpu.dot_dimension_numbers<[2], [1], [1], [2], [0, 0, 0, 1, 1, 2], [0], [0]>, precision = #tpu.contract_precision<fp32>} : vector<1x1x8xf32>, vector<1x8x16xf32>, vector<1x1x16xf32> -> vector<1x1x16xf32>
    "tpu.trace_stop"() : () -> ()
    %25 = arith.addf %23, %24 : vector<1x1x16xf32>
    %c0_23 = arith.constant 0 : index
    %c0_24 = arith.constant 0 : index
    %c0_25 = arith.constant 0 : index
    %26 = vector.load %arg10[%c0_23, %c0_24, %c0_25] : memref<1x1x16xf32, #tpu.memory_space<vmem>>, vector<1x1x16xf32>
    tpu.vector_store %arg10[%c0_23, %c0_24, %c0_25], %25 {strides = array<i32>} : memref<1x1x16xf32, #tpu.memory_space<vmem>>, vector<1x1x16xf32>,
    %c0_i32_26 = arith.constant 0 : i32
    %27 = arith.cmpi eq, %arg2, %c0_i32_26 : i32
    %28 = arith.extui %27 : i1 to i32
    %c0_i32_27 = arith.constant 0 : i32
    %29 = arith.cmpi ne, %28, %c0_i32_27 : i32
    scf.if %29 {
      %c0_28 = arith.constant 0 : index
      %c0_29 = arith.constant 0 : index
      %c0_30 = arith.constant 0 : index
      %30 = vector.load %arg9[%c0_28, %c0_29, %c0_30] : memref<1x1x16xf32, #tpu.memory_space<vmem>>, vector<1x1x16xf32>
      %cst_31 = arith.constant 9.99999993E-9 : f32
      %31 = vector.broadcast %cst_31 : f32 to vector<1x1x16xf32>
      %32 = arith.addf %30, %31 : vector<1x1x16xf32>
      %33 = tpu.reciprocal %32 : vector<1x1x16xf32> -> vector<1x1x16xf32>
      %c0_32 = arith.constant 0 : index
      %c0_33 = arith.constant 0 : index
      %c0_34 = arith.constant 0 : index
      %34 = vector.load %arg10[%c0_32, %c0_33, %c0_34] : memref<1x1x16xf32, #tpu.memory_space<vmem>>, vector<1x1x16xf32>
      %35 = arith.mulf %34, %33 : vector<1x1x16xf32>
      %c0_35 = arith.constant 0 : index
      %c0_36 = arith.constant 0 : index
      %36 = vector.load %arg4[%c0_35, %c0_36] : memref<4x3xf32, #tpu.memory_space<vmem>>, vector<4x3xf32>
      %37 = vector.extract_strided_slice %36 {offsets = [0, 0], sizes = [4, 1], strides = [1, 1]} : vector<4x3xf32> to vector<4x1xf32>
      %38 = vector.shape_cast %37 : vector<4x1xf32> to vector<1x4x1xf32>
      %39 = vector.extract_strided_slice %36 {offsets = [0, 1], sizes = [4, 1], strides = [1, 1]} : vector<4x3xf32> to vector<4x1xf32>
      %40 = vector.shape_cast %39 : vector<4x1xf32> to vector<1x4x1xf32>
      %41 = vector.extract_strided_slice %36 {offsets = [0, 2], sizes = [4, 1], strides = [1, 1]} : vector<4x3xf32> to vector<4x1xf32>
      %42 = vector.shape_cast %41 : vector<4x1xf32> to vector<1x4x1xf32>
      %43 = vector.broadcast %30 : vector<1x1x16xf32> to vector<1x4x16xf32>
      %44 = vector.broadcast %38 : vector<1x4x1xf32> to vector<1x4x16xf32>
      %45 = arith.mulf %43, %44 : vector<1x4x16xf32>
      %46 = vector.broadcast %35 : vector<1x1x16xf32> to vector<1x4x16xf32>
      %47 = vector.broadcast %40 : vector<1x4x1xf32> to vector<1x4x16xf32>
      %48 = arith.mulf %46, %47 : vector<1x4x16xf32>
      %49 = arith.addf %45, %48 : vector<1x4x16xf32>
      %50 = vector.broadcast %42 : vector<1x4x1xf32> to vector<1x4x16xf32>
      %51 = arith.addf %49, %50 : vector<1x4x16xf32>
      %c0_37 = arith.constant 0 : index
      %c0_38 = arith.constant 0 : index
      %c0_39 = arith.constant 0 : index
      %52 = vector.load %arg8[%c0_37, %c0_38, %c0_39] : memref<1x4x16xf32, #tpu.memory_space<vmem>>, vector<1x4x16xf32>
      tpu.vector_store %arg8[%c0_37, %c0_38, %c0_39], %51 {strides = array<i32>} : memref<1x4x16xf32, #tpu.memory_space<vmem>>, vector<1x4x16xf32>,
    } else {
    }
    return
  }
  func.func @transform_0(%arg0: i32, %arg1: i32, %arg2: i32) -> (i32, i32) {
    %c0_i32 = arith.constant 0 : i32
    %c0_i32_0 = arith.constant 0 : i32
    %c0_i32_1 = arith.constant 0 : i32
    return %c0_i32, %c0_i32_0 : i32, i32
  }
  func.func @transform_1(%arg0: i32, %arg1: i32, %arg2: i32) -> (i32, i32) {
    %c0_i32 = arith.constant 0 : i32
    %c0_i32_0 = arith.constant 0 : i32
    %c0_i32_1 = arith.constant 0 : i32
    return %c0_i32, %c0_i32_0 : i32, i32
  }
  func.func @transform_2(%arg0: i32, %arg1: i32, %arg2: i32) -> (i32, i32, i32) {
    %c0_i32 = arith.constant 0 : i32
    %c0_i32_0 = arith.constant 0 : i32
    return %arg0, %c0_i32, %arg1 : i32, i32, i32
  }
  func.func @transform_3(%arg0: i32, %arg1: i32, %arg2: i32) -> (i32, i32, i32) {
    %c0_i32 = arith.constant 0 : i32
    %c0_i32_0 = arith.constant 0 : i32
    return %arg0, %arg2, %c0_i32 : i32, i32, i32
  }
  func.func @transform_4(%arg0: i32, %arg1: i32, %arg2: i32) -> (i32, i32, i32) {
    %c0_i32 = arith.constant 0 : i32
    %c0_i32_0 = arith.constant 0 : i32
    return %arg0, %c0_i32, %arg2 : i32, i32, i32
  }
  func.func @transform_5(%arg0: i32, %arg1: i32, %arg2: i32) -> (i32, i32, i32) {
    %c0_i32 = arith.constant 0 : i32
    %c0_i32_0 = arith.constant 0 : i32
    return %arg0, %c0_i32, %arg1 : i32, i32, i32
  }
}

</mosaic_0001>

<bundles_post_ra>
// kernel: conv_deep_set.1
= control target key start
LH: loop header
LB: loop body
LE: loop exit
PB: predicated region body
PF: predicated region fallthrough
CT: control target
= control target key end

     0   :  { %10 = vsyncpa [#allocation6], 0  ;;  %s1920_s0 = inlined_call_operand.vmem [shape: f32[1,2], index: 0, kind: input, shape index: {}]   ;;  %s1921_s1 = inlined_call_operand.vmem [shape: f32[4,3], index: 1, kind: input, shape index: {}]   ;;  %s1922_s2 = inlined_call_operand.vmem [shape: f32[2,1,16], index: 2, kind: input, shape index: {}]   ;;  %s1923_s3 = inlined_call_operand.vmem [shape: f32[2,8,1], index: 3, kind: input, shape index: {}]   ;;  %s1924_s4 = inlined_call_operand.vmem [shape: f32[2,1,8], index: 4, kind: input, shape index: {}]   ;;  %s1925_s5 = inlined_call_operand.hbm [shape: f32[2,4,16], index: 5, kind: output, shape index: {}]  }
   0x1   :  { %11 = vsyncpa [#allocation5], 0 }
   0x2   :  { %13 = vsyncpa [#allocation5 + $0x1], 0  ;;  %s1739_s18 = smov 0   ;;  %s1741_s19 = smov 0  }
   0x3   :  { %s1743_s20 = smov 0   ;;  %s1745_s21 = smov 0  }
   0x4   :  { %s1747_s22 = smov 0   ;;  %s1749_s23 = smov 0  }
   0x5 LB: > { %s1420_s24 = sadd.s32 4294967295, %s1699_s23   ;;  %s1421_s25 = sadd.s32 4294967294, %s1699_s23   ;;  %s1699_s23 = sphi %s1749_s23, %s19_s23   ;;  %s1695_s22 = sphi %s1747_s22, %s1934_s22   ;;  %s1691_s21 = sphi %s1745_s21, %s1933_s21   ;;  %s1687_s20 = sphi %s1743_s20, %s1932_s20   ;;  %s1683_s19 = sphi %s1741_s19, %s1931_s19   ;;  %s1679_s18 = sphi %s1739_s18, %s1930_s18  }
   0x6   : > { %s38_s26 = sadd.s32 1, %s1695_s22  ;;  %s173_s27 = sadd.s32 1, %s1687_s20 }
   0x7   : > { %p40_p0 = scmp.ge.s32.totalorder %s38_s26, 2  ;;  %p183_p1 = scmp.ne.s32.totalorder %s1687_s20, %s1683_s19 }
   0x8   : > { %p184_p2 = scmp.eq.s32.totalorder %s1420_s24, 1  ;;  %p189_p3 = scmp.ne.s32.totalorder %s1683_s19, %s1679_s18 }
   0x9   : > { %s1936_s26 = smov (%p40_p0, %s38_s26), 0  ;;  %p190_p5 = scmp.eq.s32.totalorder %s1421_s25, 1 }
   0xa   : > { %p1779_p4 = por %p184_p2, %p183_p1  ;;  %s168_s29 = ssub.s32 %s1695_s22, %s1936_s26 }
   0xb   : > { %p1422_p6 = scmp.ge.s32.totalorder %s1699_s23, 1  ;;  %p171_p7 = scmp.eq.s32.totalorder %s168_s29, 0 }
   0xc   : > { %p1786_p8 = por %p190_p5, %p189_p3  ;;  %p197_p9 = scmp.lt.s32.totalorder %s1699_s23, 3 }
   0xd   : > { %s1792_s6 = scalar_select %p171_p7, %s1687_s20, %s173_s27  }
   0xe   : > { %p1794_p10 = pnand %p1422_p6, %p197_p9  ;;  %p1798_p11 = scmp.eq.s32.totalorder %s1420_s24, 0 }
   0xf   : > { %s210_s11 = sshll.u32 %s1920_s0, 4  ;;  %s211_s11 = int_to_ptr.vmem [resolvable:$true] %s210_s11 }
  0x10   : > { %p1528_p12 = pneg %p1794_p10  ;;  %s1604_s12 = scalar_lea.vmem %s211_s11, 16 }
  0x11   : > { %p1605_p0 = scmp.ne.s32.totalorder %s211_s11, %s1604_s12  ;;  %p1612_p5 = scmp.lt.s32.totalorder %s211_s11, %s211_s11 }
  0x12   : > { %p1529_p13 = pnand %p1798_p11, %p1528_p12  ;;  %p1613_p6 = scmp.lt.s32.totalorder %s1604_s12, %s1604_s12 }
  0x14   : > { %p1606_p1 = pneg %p1529_p13  ;;  %p1614_p7 = por %p1613_p6, %p1612_p5 }
  0x16   : > { %p1607_p2 = pnand %p1606_p1, %p1605_p0 }
  0x18   : > { %p1608_p3 = pneg %p1607_p2 }
  0x1a   : > { %p1615_p9 = pnand %p1614_p7, %p1608_p3 }
  0x1c   : > { %1618 = shalt.err (!%p1615_p9)
}
  0x1d   : > { %s1701_s13 = smov [#allocation4]   ;;  %254 = sbr.rel (%p1794_p10) target bundleno = 453 (0x1c5), region = 40 }
  0x1e   : > { %1531 = dma.vmem_to_smem (!%p1529_p13), %s211_s11, 16, %s1701_s13, [#allocation6]  }
  0x22   : > { %1670 = dma.done.wait (%p1798_p11), [#allocation6], 16  }
  0x23   : > { %1672 = vsyncadd (%p1798_p11), [#allocation6], 4294967280 }
  0x24   : > { %260 = sfence }
  0x25   : > { %p297_p12 = scmp.lt.s32.totalorder %s1691_s21, 1  ;;  %v1702_v0 = vmov 0   ;;  %v1263_v2 = vld [vmem:[%s1921_s1] sm:$0xf]  ;;  %v1703_v3 = vmov 0.0   ;;  %vm1704_vm0 = vmmov 0  }
  0x26   : > { %1594 = vset.pattern.permute.xlu0 %v1702_v0  ;;  %1462 = vmatprep.subr.mxu0 %v1703_v3  ;;  %v1705_v4 = vmov 1   ;;  %v1706_v5 = vmov 2   ;;  %s324_s29 = sld [smem:[#allocation4]]  ;;  %vm350_vm1 = vcmask 64512   ;;  %v1707_v37 = vmov 1.0   ;;  %s1435_s16 = sshll.u32 %s1691_s21, 6 }
  0x27   : > { %s1817_s14 = scalar_select %p297_p12, %s1691_s21, 1  ;;  %1467 = vmatprep.subr.mxu1 %v1703_v3  ;;  %1464 = vmatprep.mubr.msk.f32.mxu0 %vm1704_vm0, %v1703_v3  ;;  %v352_v14 = vsel %vm350_vm1, 1.0, %v1702_v0  ;;  %vm320_vm2 = vcmask 122880   ;;  %vm1293_vm3 = vcmask 125952  }
  0x28   : > { %1469 = vmatprep.mubr.msk.f32.mxu1 %vm1704_vm0, %v1703_v3  ;;  %1595 = vset.pattern.permute.xlu1 %v1705_v4  ;;  %s1429_s7 = sld [smem:[#allocation4 + $0x1]]  ;;  %v421_v17 = vsub.f32 %v352_v14, %v352_v14  ;;  %321 = vst.msk [vmem:[#allocation2] sm:$0x1] %vm320_vm2, %v1703_v3  ;;  %322 = vst.msk [vmem:[#allocation3] sm:$0x1] %vm320_vm2, %v1703_v3  ;;  %s1708_s9 = smov [#allocation7]  }
  0x29   : > { %s1428_s15 = sshll.u32 %s1817_s14, 3  ;;  %1283 = vperm.xlu1 %1595, %v1263_v2   ;;  %s302_s10 = scalar_lea.vmem %s1922_s2, %s1817_s14 }
  0x2a   : > { %s309_s24 = scalar_lea.vmem %s1923_s3, %s1428_s15  ;;  %v1430_v6 = vld [vmem:[%s302_s10] ss:$0 sm:$0xff]  ;;  %s315_s13 = scalar_lea.vmem %s1924_s4, %s1817_s14  ;;  %v422_v19 = vand.u32 4294901760, %v421_v17 }
  0x2b   : > { %v326_v1 = vld [vmem:[%s309_s24] sm:$0xff]  ;;  %s294_s14 = sand.u32 1, %s1683_s19   ;;  %s1623_s10 = sshll.u32 %s1708_s9, 4  ;;  %s1624_s10 = int_to_ptr.vmem [resolvable:$false] %s1623_s10 }
  0x2c   : > { %330 = vperm.xlu0 %1594, %v326_v1   ;;  %v341_v9 = vstv %s324_s29  ;;  %v327_v18 = vld [vmem:[%s315_s13] sm:$0x1]  ;;  %v423_v21 = vsub.f32 %v421_v17, %v422_v19  ;;  %s1427_s15 = sshll.u32 %s294_s14, 2  ;;  %s1308_s29 = scalar_lea.hbm %s1925_s5, %s1435_s16 }
  0x2d   : > { %1596 = vset.pattern.permute.xlu1 %v1706_v5  ;;  %v805_v20 = vsel %vm350_vm1, %v327_v18, 0  ;;  %s296_s17 = scalar_lea.vmem [#allocation7], %s1427_s15  ;;  %s1625_s21 = scalar_lea.vmem %s1624_s10, 128 }
  0x2e   : > { %1289 = vperm.xlu1 %1596, %v1263_v2   ;;  %v345_v10 = vstv %s1429_s7  ;;  %v873_v22 = vand.u32 4294901760, %v805_v20  ;;  %v424_v24 = vand.u32 4294901760, %v423_v21  ;;  %s1310_s24 = sshll.u32 %s296_s17, 4  ;;  %s1296_s7 = scalar_lea.sflag [#allocation5], %s294_s14  ;;  %s1311_s24 = int_to_ptr.vmem [resolvable:$true] %s1310_s24 }
  0x2f   : > { %v349_v57 = vld [vmem:[#allocation2] sm:$0x1]  ;;  %s1619_s8 = scalar_lea.vmem %s1311_s24, 64  ;;  %p1626_p0 = scmp.lt.s32.totalorder %s1311_s24, %s1624_s10 }
  0x30   : > { %1272 = vperm.xlu0 %1594, %v1263_v2   ;;  %v874_v26 = vsub.f32 %v805_v20, %v873_v22  ;;  %p1620_p10 = scmp.ne.s32.totalorder %s1311_s24, %s1619_s8  ;;  %p1627_p1 = scmp.lt.s32.totalorder %s1625_s21, %s1619_s8 }
  0x32   : > { %v875_v31 = vand.u32 4294901760, %v874_v26  ;;  %p1621_p11 = pnand %p1620_p10, %p1779_p4  ;;  %p1628_p2 = por %p1627_p1, %p1626_p0 }
  0x34   : > { %1597 = vset.pattern.permute.xlu0 %v1706_v5  ;;  %v876_v35 = vsub.f32 %v874_v26, %v875_v31  ;;  %p1622_p13 = pneg %p1621_p11 }
  0x36   : > { %v877_v38 = vand.u32 4294901760, %v876_v35  ;;  %p1629_p3 = pnand %p1628_p2, %p1622_p13 }
  0xa4   : > { %v1284_v21 = vpop.permute.xlu1 %1283 }
  0xa7   : > { %v331_v7 = vpop.permute.xlu0 %330 }
  0xa8   : > { %v339_v8 = vsub.f32 %v331_v7, %v1430_v6 }
  0xaa   : > { %v340_v11 = vmul.f32 %v339_v8, %v339_v8 }
  0xac   : > { %v342_v12 = vmul.f32 %v341_v9, %v340_v11  ;;  %v346_v13 = vmul.f32 %v345_v10, %v340_v11  ;;  %v803_v10 = vld [vmem:[#allocation3] sm:$0x1] }
  0xae   : > { %v343_v15 = vmul.f32 1.442695, %v342_v12  ;;  %v347_v16 = vmul.f32 1.442695, %v346_v13 }
  0xb0   : > { %1598 = vpow2.f32 %v343_v15 }
  0xb1   : > { %1600 = vpow2.f32 %v347_v16 }
  0xbd   : > { %v1599_v23 = vpop.eup %1598 }
  0xbe   : > { %v1601_v25 = vpop.eup %1600  ;;  %v385_v27 = vand.u32 4294901760, %v1599_v23 }
  0xbf   : > { %v838_v29 = vand.u32 4294901760, %v1601_v25 }
  0xc0   : > { %1463 = vmatpush3.msra.mxu0 %v385_v27  ;;  %v462_v28 = vsub.f32 %v1599_v23, %v385_v27 }
  0xc1   : > { %1465 = vmatmul.mubr.f32.vlgmr.msra.gmra.mxu0 %v424_v24  ;;  %1472 = vmatprep.subr.mxu0 %v1703_v3  ;;  %v915_v33 = vsub.f32 %v1601_v25, %v838_v29 }
  0xc2   : > { %1473 = vmatpush3.msra.mxu0 %v462_v28  ;;  %1474 = vmatprep.mubr.msk.f32.mxu0 %vm1704_vm0, %v1703_v3  ;;  %v463_v30 = vand.u32 4294901760, %v462_v28 }
  0xc3   : > { %1482 = vmatprep.subr.mxu0 %v1703_v3  ;;  %v916_v36 = vand.u32 4294901760, %v915_v33 }
  0xc4   : > { %v464_v32 = vsub.f32 %v462_v28, %v463_v30 }
  0xc5   : > { %1475 = vmatmul.mubr.f32.vlgmr.msra.gmra.mxu0 %v421_v17  ;;  %v917_v39 = vsub.f32 %v915_v33, %v916_v36  ;;  %v1265_v17 = vlaneseq }
  0xc6   : > { %1483 = vmatpush3.msra.mxu0 %v463_v30  ;;  %v465_v34 = vand.u32 4294901760, %v464_v32  ;;  %1484 = vmatprep.mubr.msk.f32.mxu0 %vm1704_vm0, %v1703_v3 }
  0xc7   : > { %1492 = vmatprep.subr.mxu0 %v1703_v3  ;;  %v918_v40 = vand.u32 4294901760, %v917_v39  ;;  %v1266_v18 = vshrl.u32 %v1265_v17, 7 }
  0xc8   : > { %1468 = vmatpush3.msra.mxu1 %v465_v34 }
  0xc9   : > { %1470 = vmatmul.mubr.msk.f32.vlgmr.msra.gmra.mxu1 %vm350_vm1, %v1707_v37  ;;  %1477 = vmatprep.subr.mxu1 %v1703_v3 }
  0xca   : > { %1485 = vmatmul.mubr.msk.f32.vlgmr.msra.gmra.mxu0 %vm350_vm1, %v1707_v37  ;;  %1478 = vmatpush3.msra.mxu1 %v385_v27 }
  0xcb   : > { %1493 = vmatpush3.msra.mxu0 %v838_v29  ;;  %1479 = vmatprep.mubr.msk.f32.mxu1 %vm1704_vm0, %v1703_v3 }
  0xcc   : > { %1487 = vmatprep.subr.mxu1 %v1703_v3  ;;  %1494 = vmatprep.mubr.msk.f32.mxu0 %vm1704_vm0, %v1703_v3 }
  0xcd   : > { %1502 = vmatprep.subr.mxu0 %v1703_v3  ;;  %1480 = vmatmul.mubr.f32.vlgmr.msra.gmra.mxu1 %v422_v19  ;;  %v1267_v19 = vsub.s32 0, %v1266_v18 }
  0xce   : > { %1488 = vmatpush3.msra.mxu1 %v385_v27  ;;  %1495 = vmatmul.mubr.f32.vlgmr.msra.gmra.mxu0 %v877_v38 }
  0xcf   : > { %1503 = vmatpush3.msra.mxu0 %v915_v33  ;;  %1489 = vmatprep.mubr.msk.f32.mxu1 %vm1704_vm0, %v1703_v3 }
  0xd0   : > { %1497 = vmatprep.subr.mxu1 %v1703_v3  ;;  %1504 = vmatprep.mubr.msk.f32.mxu0 %vm1704_vm0, %v1703_v3 }
  0xd1   : > { %1512 = vmatprep.subr.mxu0 %v1703_v3  ;;  %1490 = vmatmul.mubr.msk.f32.vlgmr.msra.gmra.mxu1 %vm350_vm1, %v1707_v37 }
  0xd2   : > { %1498 = vmatpush3.msra.mxu1 %v918_v40  ;;  %1505 = vmatmul.mubr.f32.vlgmr.msra.gmra.mxu0 %v874_v26  ;;  %v1273_v26 = vpop.permute.xlu0 %1272 }
  0xd3   : > { %1513 = vmatpush3.msra.mxu0 %v916_v36  ;;  %1499 = vmatprep.mubr.msk.f32.mxu1 %vm1704_vm0, %v1703_v3 }
  0xd4   : > { %1507 = vmatprep.subr.mxu1 %v1703_v3  ;;  %1514 = vmatprep.mubr.msk.f32.mxu0 %vm1704_vm0, %v1703_v3 }
  0xd5   : > { %1500 = vmatmul.mubr.f32.vlgmr.msra.gmra.mxu1 %v873_v22 }
  0xd6   : > { %1508 = vmatpush3.msra.mxu1 %v838_v29  ;;  %1509 = vmatprep.mubr.msk.f32.mxu1 %vm1704_vm0, %v1703_v3 }
  0xd7   : > { %1517 = vmatprep.subr.mxu1 %v1703_v3  ;;  %1515 = vmatmul.mubr.f32.vlgmr.msra.gmra.mxu0 %v873_v22 }
  0xd9   : > { %1510 = vmatmul.mubr.f32.vlgmr.msra.gmra.mxu1 %v875_v31 }
  0xda   : > { %1518 = vmatpush3.msra.mxu1 %v838_v29  ;;  %1519 = vmatprep.mubr.msk.f32.mxu1 %vm1704_vm0, %v1703_v3  ;;  %v1290_v29 = vpop.permute.xlu1 %1289 }
  0xdd   : > { %1520 = vmatmul.mubr.f32.vlgmr.msra.gmra.mxu1 %v873_v22 }
 0x181   : > { %v426_v41 = vpop.f32.mrf.mxu0 }
 0x183   : > { %v1466_v42 = vpop.f32.mrf.mxu0 }
 0x185   : > { %v576_v43 = vpop.f32.mrf.mxu0 }
 0x187   : > { %v1476_v44 = vpop.f32.mrf.mxu0 }
 0x189   : > { %v502_v45 = vpop.f32.mrf.mxu1 }
 0x18a   : > { %v503_v46 = vadd.f32 %v502_v45, %v426_v41  ;;  %v724_v47 = vpop.f32.mrf.mxu0 }
 0x18b   : > { %v1471_v48 = vpop.f32.mrf.mxu1 }
 0x18c   : > { %v577_v49 = vadd.f32 %v576_v43, %v503_v46  ;;  %v1486_v50 = vpop.f32.mrf.mxu0 }
 0x18d   : > { %v650_v51 = vpop.f32.mrf.mxu1 }
 0x18e   : > { %v651_v52 = vadd.f32 %v650_v51, %v577_v49  ;;  %v879_v53 = vpop.f32.mrf.mxu0 }
 0x18f   : > { %v1481_v54 = vpop.f32.mrf.mxu1 }
 0x190   : > { %v725_v55 = vadd.f32 %v724_v47, %v651_v52  ;;  %v1496_v56 = vpop.f32.mrf.mxu0 }
 0x191   : > { %v796_v58 = vpop.f32.mrf.mxu1 }
 0x192   : > { %v797_v59 = vadd.f32 %v796_v58, %v725_v55  ;;  %v1029_v60 = vpop.f32.mrf.mxu0 }
 0x193   : > { %v1491_v61 = vpop.f32.mrf.mxu1 }
 0x194   : > { %v800_v62 = vadd.f32 %v797_v59, %v349_v57  ;;  %v1506_v63 = vpop.f32.mrf.mxu0 }
 0x195   : > { %v955_v0 = vpop.f32.mrf.mxu1 }
 0x196   : > { %802 = vst.msk [vmem:[#allocation2] sm:$0x1] %vm320_vm2, %v800_v62  ;;  %v956_v1 = vadd.f32 %v955_v0, %v879_v53 }
 0x197   : > { %v1501_v2 = vpop.f32.mrf.mxu1  ;;  %v1177_v3 = vpop.f32.mrf.mxu0 }
 0x198   : > { %v1030_v4 = vadd.f32 %v1029_v60, %v956_v1 }
 0x199   : > { %v1103_v5 = vpop.f32.mrf.mxu1  ;;  %v1516_v6 = vpop.f32.mrf.mxu0 }
 0x19a   : > { %v1104_v7 = vadd.f32 %v1103_v5, %v1030_v4 }
 0x19b   : > { %v1511_v8 = vpop.f32.mrf.mxu1 }
 0x19c   : > { %v1178_v9 = vadd.f32 %v1177_v3, %v1104_v7 }
 0x19d   : > { %v1249_v11 = vpop.f32.mrf.mxu1  ;;  %v1258_v12 = vld [vmem:[#allocation2] sm:$0x1] }
 0x19e   : > { %v1250_v13 = vadd.f32 %v1249_v11, %v1178_v9  ;;  %v1259_v14 = vadd.f32 1e-08, %v1258_v12  ;;  %v1268_v24 = vrot.slane %v1258_v12, %v1267_v19 }
 0x19f   : > { %v1521_v15 = vpop.f32.mrf.mxu1 }
 0x1a0   : > { %v1253_v16 = vadd.f32 %v1250_v13, %v803_v10  ;;  %1602 = vrcp.f32 %v1259_v14  ;;  %v1275_v28 = vmul.f32 %v1273_v26, %v1268_v24 }
 0x1a2   : > { %1254 = vst.msk [vmem:[#allocation3] sm:$0x1] %vm320_vm2, %v1253_v16 }
 0x1a9   : > { %v1261_v22 = vld [vmem:[#allocation3] sm:$0x1] }
 0x1ad   : > { %v1603_v20 = vpop.eup %1602 }
 0x1ae   : > { %v1262_v23 = vmul.f32 %v1603_v20, %v1261_v22 }
 0x1b0   : > { %v1280_v25 = vrot.slane %v1262_v23, %v1267_v19 }
 0x1b2   : > { %v1286_v27 = vmul.f32 %v1284_v21, %v1280_v25 }
 0x1b4   : > { %v1287_v30 = vadd.f32 %v1286_v27, %v1275_v28 }
 0x1b6   : > { %v1292_v31 = vadd.f32 %v1290_v29, %v1287_v30 }
 0x1b8   : > { %1294 = vst.msk [vmem:[%s296_s17] sm:$0xf] %vm1293_vm3, %v1292_v31 }
 0x1b9   : > { %1632 = shalt.err (!%p1629_p3)
}
 0x1ba   : > { %s1633_s11 = scalar_lea.hbm %s1308_s29, 64  ;;  %s1637_s14 = scalar_lea.hbm %s1925_s5, 128 }
 0x1bb   : > { %p1634_p5 = scmp.ne.s32.totalorder %s1308_s29, %s1633_s11  ;;  %p1638_p9 = scmp.lt.s32.totalorder %s1308_s29, %s1925_s5 }
 0x1bc   : > { %p1639_p12 = scmp.lt.s32.totalorder %s1637_s14, %s1633_s11 }
 0x1bd   : > { %p1635_p6 = pnand %p1634_p5, %p1779_p4 }
 0x1be   : > { %p1640_p10 = por %p1639_p12, %p1638_p9 }
 0x1bf   : > { %p1636_p7 = pneg %p1635_p6 }
 0x1c1   : > { %p1641_p11 = pnand %p1640_p10, %p1636_p7 }
 0x1c3   : > { %1644 = shalt.err (!%p1641_p11)
}
 0x1c4   : > { %1526 = dma.vmem_to_hbm [thread:$0]  (%p1779_p4), %s1311_s24, 64, %s1308_s29, %s1296_s7  }
 0x1c5 PF: > { %p1538_p13 = scmp.ge.s32.totalorder %s1699_s23, 2  ;;  %s1322_s17 = sand.u32 1, %s1679_s18  }
 0x1c6   : > { %s1323_s25 = scalar_lea.sflag [#allocation5], %s1322_s17 }
 0x1c7   : > { %p1533_p0 = pnand %p1538_p13, %p1786_p8 }
 0x1c9   : > { %p1534_p1 = pneg %p1533_p0 }
 0x1cb   : > { %1674 = dma.done.wait (%p1534_p1), %s1323_s25, 64  }
 0x1cc   : > { %1676 = vsyncadd (%p1534_p1), %s1323_s25, 4294967232  ;;  %s19_s23 = sadd.s32 1, %s1699_s23   ;;  %s1930_s18 = smov %s1683_s19 }
 0x1cd   : > { %p16_p2 = scmp.ge.s32.totalorder %s19_s23, 4   ;;  %s1931_s19 = smov %s1687_s20 }
 0x1ce   : > { %s1932_s20 = smov %s1792_s6  ;;  %s1933_s21 = smov %s1695_s22 }
 0x1cf   : > { %s1934_s22 = smov %s1936_s26  ;;  %18 = sbr.rel (!%p16_p2) target bundleno = 5 (0x5), region = 94 }
 0x1d4   :  { %1328 = vsyncpa [#allocation5], 1 }
 0x1d5   :  { %1330 = vsyncpa [#allocation5 + $0x1], 1 }
 0x1d6   :  { %1331 = vsyncpa [#allocation6], 1 }
 0x1d7   :  { %1333 = vsyncpa [#allocation6 + $0x1], 1 }

</bundles_post_ra>
